<compile_context>
chip_gen: v7x
topology: tpu7x:2x2x1
jax: 0.10.0
libtpu: 0.0.40
codegen_flags: <defaults>
</compile_context>

<pallas_src>
import functools

import jax
import jax.numpy as jnp
from jax import lax
from jax.experimental import pallas as pl
from jax.experimental.pallas import tpu as pltpu


# Conservative VMEM budget: v7x has 64 MiB physical / ~32 MiB default scoped.
_VMEM_BUDGET_BYTES = 24 * 1024 * 1024


def _vmem_limit_bytes(resident_bytes):
    # Explicit scoped-VMEM request: resident data + compiler headroom, capped
    # well below the smallest physical VMEM (v7x: 64 MiB).
    return int(min(max(2 * resident_bytes + (8 << 20), 16 << 20), 48 << 20))


def _loss_lane_index():
    # (1, 2) iota over the lane axis: lane 0 -> dist_loss, lane 1 -> kl_loss.
    return lax.broadcasted_iota(jnp.int32, (1, 2), 1)


def vae_fused_kernel(h_ref, wh_ref, bh_ref, wd_ref, bd_ref, eps_ref, out_ref):
    """Grid-less single-shot kernel: all operands resident in VMEM."""
    B, D = h_ref.shape
    L = eps_ref.shape[1]

    h = h_ref[...]

    # Fused encoder heads: one (B,D) @ (D,2L) MXU matmul instead of two (D,L) ones.
    heads = jnp.dot(h, wh_ref[...], preferred_element_type=jnp.float32) + bh_ref[...]
    mean = heads[:, :L]
    logv = heads[:, L:]

    # Reparameterize: z = eps * exp(0.5*logv) + mean.  std is reused below so
    # exp(logv) is never recomputed (one EUP transcendental pass saved).
    std = jnp.exp(0.5 * logv)
    z = eps_ref[...] * std + mean

    # Decoder.
    recon = jnp.dot(z, wd_ref[...], preferred_element_type=jnp.float32) + bd_ref[...]

    # dist_loss = mean((recon - h)^2)
    diff = recon - h
    dist = jnp.sum(diff * diff, keepdims=True) * (1.0 / (B * D))                      # (1,1)

    # kl_loss = -0.5 * sum(1 + logv - mean^2 - exp(logv)) / B,  exp(logv) == std*std
    kl = jnp.sum(1.0 + logv - mean * mean - std * std, keepdims=True) * (-0.5 / B)    # (1,1)

    # Single (1,2) output: lane 0 = dist_loss, lane 1 = kl_loss (one output stream).
    idx = _loss_lane_index()
    out_ref[...] = jnp.where(idx == 0, dist, kl).astype(out_ref.dtype)


def vae_tiled_kernel(h_ref, wh_ref, bh_ref, wd_ref, bd_ref, eps_ref, out_ref,
                     acc_ref, *, total_batch):
    """Batch-tiled kernel: weights resident, loss sums accumulated in VMEM scratch."""
    i = pl.program_id(0)
    D = h_ref.shape[1]
    L = eps_ref.shape[1]
    idx = _loss_lane_index()

    @pl.when(i == 0)
    def _init():
        acc_ref[...] = jnp.zeros_like(acc_ref)

    h = h_ref[...]
    heads = jnp.dot(h, wh_ref[...], preferred_element_type=jnp.float32) + bh_ref[...]
    mean = heads[:, :L]
    logv = heads[:, L:]
    std = jnp.exp(0.5 * logv)
    z = eps_ref[...] * std + mean
    recon = jnp.dot(z, wd_ref[...], preferred_element_type=jnp.float32) + bd_ref[...]

    diff = recon - h
    sse = jnp.sum(diff * diff, keepdims=True)                               # (1,1)
    kls = jnp.sum(1.0 + logv - mean * mean - std * std, keepdims=True)      # (1,1)
    acc_ref[...] += jnp.where(idx == 0, sse, kls)

    @pl.when(i == pl.num_programs(0) - 1)
    def _finalize():
        scale = jnp.where(idx == 0, 1.0 / (total_batch * D), -0.5 / total_batch)
        out_ref[...] = (acc_ref[...] * scale).astype(out_ref.dtype)


def vae_forward(h, wm, bm, wv, bv, wd, bd, eps, *, batch_tile=None):
    """Pallas VAE forward.

    h: (B, D); wm/wv: (D, L) pre-transposed weights; bm/bv: (1, L); wd: (L, D);
    bd: (1, D); eps: (B, L) standard-normal noise.  Returns (dist_loss, kl_loss).
    """
    B, D = h.shape
    L = wm.shape[1]

    # Wrapper-side head fusion: hidden2mean | hidden2logv -> one (D, 2L) weight.
    w_heads = jnp.concatenate([wm, wv], axis=1)                                  # (D, 2L)
    b_heads = jnp.concatenate([bm.reshape(1, L), bv.reshape(1, L)], axis=1)      # (1, 2L)
    bd2 = bd.reshape(1, D)

    itemsize = 4  # f32
    weight_bytes = itemsize * (w_heads.size + b_heads.size + wd.size + bd2.size)
    act_bytes = itemsize * (h.size + eps.size)

    if batch_tile is None and (weight_bytes + act_bytes) <= _VMEM_BUDGET_BYTES:
        # Single grid-less step: no pipeline -> a single VMEM copy of every operand.
        out = pl.pallas_call(
            vae_fused_kernel,
            out_shape=jax.ShapeDtypeStruct((1, 2), jnp.float32),
            in_specs=[pl.BlockSpec(memory_space=pltpu.MemorySpace.VMEM)] * 6,
            out_specs=pl.BlockSpec(memory_space=pltpu.MemorySpace.VMEM),
            compiler_params=pltpu.CompilerParams(
                vmem_limit_bytes=_vmem_limit_bytes(weight_bytes + act_bytes)),
        )(h, w_heads, b_heads, wd, bd2, eps)
    else:
        # Batch-tiled path: weights stay resident (one HBM pass), h/eps stream in
        # TB-row tiles, and the two loss sums accumulate in VMEM scratch.
        if batch_tile is None:
            tb = B
            for cand in (1024, 512, 256, 128, 64, 32, 16, 8):
                # BlockSpec double-buffers every pipelined input: count 2x.
                tile_bytes = itemsize * cand * (D + L)
                if B % cand == 0 and 2 * (weight_bytes + tile_bytes) <= _VMEM_BUDGET_BYTES:
                    tb = cand
                    break
        else:
            tb = batch_tile
        assert B % tb == 0, "batch must be divisible by the batch tile"
        assert tb % 8 == 0, "batch tile must be a multiple of 8 (f32 sublane pack)"
        tile_bytes = itemsize * tb * (D + L)
        resident = 2 * (weight_bytes + tile_bytes)   # 2x: pipeline double-buffering
        assert resident <= _VMEM_BUDGET_BYTES, (
            "tiled footprint still exceeds the VMEM budget; shrink batch_tile")
        n_tiles = B // tb

        out = pl.pallas_call(
            functools.partial(vae_tiled_kernel, total_batch=B),
            out_shape=jax.ShapeDtypeStruct((1, 2), jnp.float32),
            grid_spec=pltpu.PrefetchScalarGridSpec(
                num_scalar_prefetch=0,
                grid=(n_tiles,),
                in_specs=[
                    pl.BlockSpec((tb, D), lambda i: (i, 0)),      # h tile
                    pl.BlockSpec((D, 2 * L), lambda i: (0, 0)),   # fused head weights
                    pl.BlockSpec((1, 2 * L), lambda i: (0, 0)),   # fused head bias
                    pl.BlockSpec((L, D), lambda i: (0, 0)),       # latent2hidden.W^T
                    pl.BlockSpec((1, D), lambda i: (0, 0)),       # latent2hidden.b
                    pl.BlockSpec((tb, L), lambda i: (i, 0)),      # eps tile
                ],
                out_specs=pl.BlockSpec((1, 2), lambda i: (0, 0)),
                scratch_shapes=[pltpu.VMEM((1, 2), jnp.float32)],
            ),
            # The batch axis is a reduction axis for both losses (the output block
            # is revisited every step), so it must be "arbitrary", not "parallel".
            compiler_params=pltpu.CompilerParams(
                dimension_semantics=("arbitrary",),
                vmem_limit_bytes=_vmem_limit_bytes(resident)),
        )(h, w_heads, b_heads, wd, bd2, eps)

    return out[0, 0], out[0, 1]


if __name__ == "__main__":
    # Small shapes consistent with the module: batch=16, input_dim=128, latent_dim=32.
    B, input_dim, latent_dim = 16, 128, 32

    key = jax.random.PRNGKey(0)
    kh, kwm, kbm, kwv, kbv, kwd, kbd, keps = jax.random.split(key, 8)

    h = jax.random.normal(kh, (B, input_dim), dtype=jnp.float32)

    # Xavier-uniform weights (as in reset_params), stored pre-transposed (in, out).
    def xavier(k, fan_in, fan_out):
        bound = (6.0 / (fan_in + fan_out)) ** 0.5
        return jax.random.uniform(k, (fan_in, fan_out), jnp.float32, -bound, bound)

    wm = xavier(kwm, input_dim, latent_dim)
    wv = xavier(kwv, input_dim, latent_dim)
    wd = xavier(kwd, latent_dim, input_dim)

    bb1 = 1.0 / (input_dim ** 0.5)
    bb2 = 1.0 / (latent_dim ** 0.5)
    bm = jax.random.uniform(kbm, (1, latent_dim), jnp.float32, -bb1, bb1)
    bv = jax.random.uniform(kbv, (1, latent_dim), jnp.float32, -bb1, bb1)
    bd = jax.random.uniform(kbd, (1, input_dim), jnp.float32, -bb2, bb2)

    # torch.randn equivalent, passed explicitly so the kernel is deterministic and
    # verifiable.  Production alternative: pass a scalar seed and draw eps in-kernel
    # with pltpu.prng_seed + pltpu.stateful_normal (saves a wrapper-side XLA op and
    # an HBM roundtrip for eps).
    eps = jax.random.normal(keps, (B, latent_dim), dtype=jnp.float32)

    # Fused single-shot path (grid-less).
    dist_a, kl_a = vae_forward(h, wm, bm, wv, bv, wd, bd, eps)
    # Batch-tiled path, forced with TB=8, to exercise the scaled-problem code path.
    dist_b, kl_b = vae_forward(h, wm, bm, wv, bv, wd, bd, eps, batch_tile=8)
    jax.block_until_ready((dist_a, kl_a, dist_b, kl_b))

    # Pure-JAX reference (same math as the PyTorch module).
    mean_r = h @ wm + bm
    logv_r = h @ wv + bv
    z_r = eps * jnp.exp(0.5 * logv_r) + mean_r
    recon_r = z_r @ wd + bd
    dist_r = jnp.mean((recon_r - h) ** 2)
    kl_r = -0.5 * jnp.sum(1.0 + logv_r - mean_r ** 2 - jnp.exp(logv_r)) / B

    for name, got, want in (("dist_single", dist_a, dist_r), ("kl_single", kl_a, kl_r),
                            ("dist_tiled", dist_b, dist_r), ("kl_tiled", kl_b, kl_r)):
        assert jnp.isfinite(got), f"{name} not finite"
        assert jnp.allclose(got, want, atol=1e-4, rtol=1e-4), (
            f"{name} mismatch: {got} vs {want}")

    print("KERNEL_OK")
</pallas_src>

<mosaic_0001>
module attributes {stable_mosaic.version = 11 : i64} {
  func.func @vae_fused_kernel(%arg0: memref<16x128xf32, #tpu.memory_space<vmem>>, %arg1: memref<128x64xf32, #tpu.memory_space<vmem>>, %arg2: memref<1x64xf32, #tpu.memory_space<vmem>>, %arg3: memref<32x128xf32, #tpu.memory_space<vmem>>, %arg4: memref<1x128xf32, #tpu.memory_space<vmem>>, %arg5: memref<16x32xf32, #tpu.memory_space<vmem>>, %arg6: memref<1x2xf32, #tpu.memory_space<vmem>>) attributes {dimension_semantics = [], scalar_prefetch = 0 : i64, scratch_operands = 0 : i64, tpu.core_type = #tpu.core_type<tc>} {
    %c0 = arith.constant 0 : index
    %c0_0 = arith.constant 0 : index
    %0 = vector.load %arg0[%c0, %c0_0] : memref<16x128xf32, #tpu.memory_space<vmem>>, vector<16x128xf32>
    %c0_1 = arith.constant 0 : index
    %c0_2 = arith.constant 0 : index
    %1 = vector.load %arg1[%c0_1, %c0_2] : memref<128x64xf32, #tpu.memory_space<vmem>>, vector<128x64xf32>
    %cst = arith.constant dense<0.000000e+00> : vector<16x64xf32>
    %2 = tpu.matmul %0, %1, %cst {dimension_numbers = #tpu.dot_dimension_numbers<[1], [0], [0], [1], [0, 0, 1, 1], [], []>} : vector<16x128xf32>, vector<128x64xf32>, vector<16x64xf32> -> vector<16x64xf32>
    %c0_3 = arith.constant 0 : index
    %c0_4 = arith.constant 0 : index
    %3 = vector.load %arg2[%c0_3, %c0_4] : memref<1x64xf32, #tpu.memory_space<vmem>>, vector<1x64xf32>
    %4 = vector.broadcast %3 : vector<1x64xf32> to vector<16x64xf32>
    %5 = arith.addf %2, %4 : vector<16x64xf32>
    %6 = vector.extract_strided_slice %5 {offsets = [0, 0], sizes = [16, 32], strides = [1, 1]} : vector<16x64xf32> to vector<16x32xf32>
    %7 = vector.extract_strided_slice %5 {offsets = [0, 32], sizes = [16, 32], strides = [1, 1]} : vector<16x64xf32> to vector<16x32xf32>
    %cst_5 = arith.constant 5.000000e-01 : f32
    %8 = vector.broadcast %cst_5 : f32 to vector<16x32xf32>
    %9 = arith.mulf %8, %7 : vector<16x32xf32>
    %10 = math.exp %9 : vector<16x32xf32>
    %c0_6 = arith.constant 0 : index
    %c0_7 = arith.constant 0 : index
    %11 = vector.load %arg5[%c0_6, %c0_7] : memref<16x32xf32, #tpu.memory_space<vmem>>, vector<16x32xf32>
    %12 = arith.mulf %11, %10 : vector<16x32xf32>
    %13 = arith.addf %12, %6 : vector<16x32xf32>
    %c0_8 = arith.constant 0 : index
    %c0_9 = arith.constant 0 : index
    %14 = vector.load %arg3[%c0_8, %c0_9] : memref<32x128xf32, #tpu.memory_space<vmem>>, vector<32x128xf32>
    %cst_10 = arith.constant dense<0.000000e+00> : vector<16x128xf32>
    %15 = tpu.matmul %13, %14, %cst_10 {dimension_numbers = #tpu.dot_dimension_numbers<[1], [0], [0], [1], [0, 0, 1, 1], [], []>} : vector<16x32xf32>, vector<32x128xf32>, vector<16x128xf32> -> vector<16x128xf32>
    %c0_11 = arith.constant 0 : index
    %c0_12 = arith.constant 0 : index
    %16 = vector.load %arg4[%c0_11, %c0_12] : memref<1x128xf32, #tpu.memory_space<vmem>>, vector<1x128xf32>
    %17 = vector.broadcast %16 : vector<1x128xf32> to vector<16x128xf32>
    %18 = arith.addf %15, %17 : vector<16x128xf32>
    %19 = arith.subf %18, %0 : vector<16x128xf32>
    %20 = arith.mulf %19, %19 : vector<16x128xf32>
    %21 = vector.shape_cast %20 : vector<16x128xf32> to vector<1x16x128xf32>
    %cst_13 = arith.constant dense<0.000000e+00> : vector<1xf32>
    %22 = vector.multi_reduction <add>, %21, %cst_13 [1, 2] : vector<1x16x128xf32> to vector<1xf32>
    %23 = vector.shape_cast %22 : vector<1xf32> to vector<1x1x1xf32>
    %24 = vector.extract %23[0, 0, 0] : f32 from vector<1x1x1xf32>
    %25 = vector.broadcast %24 : f32 to vector<1x1xf32>
    %cst_14 = arith.constant 4.8828125E-4 : f32
    %26 = vector.broadcast %cst_14 : f32 to vector<1x1xf32>
    %27 = arith.mulf %25, %26 : vector<1x1xf32>
    %cst_15 = arith.constant 1.000000e+00 : f32
    %28 = vector.broadcast %cst_15 : f32 to vector<16x32xf32>
    %29 = arith.addf %28, %7 : vector<16x32xf32>
    %30 = arith.mulf %6, %6 : vector<16x32xf32>
    %31 = arith.subf %29, %30 : vector<16x32xf32>
    %32 = arith.mulf %10, %10 : vector<16x32xf32>
    %33 = arith.subf %31, %32 : vector<16x32xf32>
    %34 = vector.shape_cast %33 : vector<16x32xf32> to vector<1x16x32xf32>
    %cst_16 = arith.constant dense<0.000000e+00> : vector<1xf32>
    %35 = vector.multi_reduction <add>, %34, %cst_16 [1, 2] : vector<1x16x32xf32> to vector<1xf32>
    %36 = vector.shape_cast %35 : vector<1xf32> to vector<1x1x1xf32>
    %37 = vector.extract %36[0, 0, 0] : f32 from vector<1x1x1xf32>
    %38 = vector.broadcast %37 : f32 to vector<1x1xf32>
    %cst_17 = arith.constant -3.125000e-02 : f32
    %39 = vector.broadcast %cst_17 : f32 to vector<1x1xf32>
    %40 = arith.mulf %38, %39 : vector<1x1xf32>
    %41 = tpu.iota {dimensions = array<i32: 1>} : vector<1x2xi32>
    %c0_i32 = arith.constant 0 : i32
    %42 = vector.broadcast %c0_i32 : i32 to vector<1x2xi32>
    %43 = arith.cmpi eq, %41, %42 : vector<1x2xi32>
    %44 = vector.shape_cast %27 : vector<1x1xf32> to vector<1x1xf32>
    %45 = vector.broadcast %44 : vector<1x1xf32> to vector<1x2xf32>
    %46 = vector.shape_cast %40 : vector<1x1xf32> to vector<1x1xf32>
    %47 = vector.broadcast %46 : vector<1x1xf32> to vector<1x2xf32>
    %48 = arith.select %43, %45, %47 : vector<1x2xi1>, vector<1x2xf32>
    %c0_18 = arith.constant 0 : index
    %c0_19 = arith.constant 0 : index
    %49 = vector.load %arg6[%c0_18, %c0_19] : memref<1x2xf32, #tpu.memory_space<vmem>>, vector<1x2xf32>
    tpu.vector_store %arg6[%c0_18, %c0_19], %48 {strides = array<i32>} : memref<1x2xf32, #tpu.memory_space<vmem>>, vector<1x2xf32>,
    return
  }
}

</mosaic_0001>

<bundles_post_ra>
// kernel: tpu_custom_call.1
= control target key start
LH: loop header
LB: loop body
LE: loop exit
PB: predicated region body
PF: predicated region fallthrough
CT: control target
= control target key end

     0   :  { %s598_s0 = inlined_call_operand.vmem [shape: f32[16,128], index: 0, kind: input, shape index: {}]   ;;  %s599_s1 = inlined_call_operand.vmem [shape: f32[128,64], index: 1, kind: input, shape index: {}]   ;;  %s600_s2 = inlined_call_operand.vmem [shape: f32[1,64], index: 2, kind: input, shape index: {}]   ;;  %s601_s3 = inlined_call_operand.vmem [shape: f32[32,128], index: 3, kind: input, shape index: {}]   ;;  %s602_s4 = inlined_call_operand.vmem [shape: f32[1,128], index: 4, kind: input, shape index: {}]   ;;  %s603_s5 = inlined_call_operand.vmem [shape: f32[16,32], index: 5, kind: input, shape index: {}]   ;;  %s604_s6 = inlined_call_operand.hbm [shape: f32[1,2], index: 6, kind: output, shape index: {}]  }
   0x1   :  { %v26_v0 = vld [vmem:[%s599_s1] sm:$0xff]  ;;  %v27_v1 = vld [vmem:[%s599_s1 + $0x8] sm:$0xff]  ;;  %v28_v2 = vld [vmem:[%s599_s1 + $0x10] sm:$0xff] }
   0x2   :  { %v387_v3 = vpack.c.bf16 %v27_v1, %v26_v0  ;;  %v29_v4 = vld [vmem:[%s599_s1 + $0x18] sm:$0xff]  ;;  %v30_v6 = vld [vmem:[%s599_s1 + $0x20] sm:$0xff]  ;;  %v31_v7 = vld [vmem:[%s599_s1 + $0x28] sm:$0xff] }
   0x3   :  { %v391_v5 = vpack.c.bf16 %v29_v4, %v28_v2  ;;  %v395_v8 = vpack.c.bf16 %v31_v7, %v30_v6  ;;  %v521_v9 = vld [vmem:[%s598_s0] sm:$0xff]  ;;  %v32_v10 = vld [vmem:[%s599_s1 + $0x30] sm:$0xff]  ;;  %v33_v11 = vld [vmem:[%s599_s1 + $0x38] sm:$0xff] }
   0x4   :  { %388 = vmatprep.subr.bf16.mxu0 %v387_v3  ;;  %373 = vmatprep.mubr.f32.mxu0 %v521_v9 }
   0x5   :  { %390 = vmatpush3.bf16.msra.mxu0 %v387_v3 }
   0x6   :  { %392 = vmatprep.subr.bf16.mxu0 %v391_v5 }
   0x7   :  { %11 = vsyncpa [#allocation3], 0  ;;  %v399_v12 = vpack.c.bf16 %v33_v11, %v32_v10  ;;  %v34_v13 = vld [vmem:[%s599_s1 + $0x40] sm:$0xff]  ;;  %v35_v14 = vld [vmem:[%s599_s1 + $0x48] sm:$0xff]  ;;  %s463_s17 = smov 96   ;;  %vm155_vm0 = vcmask 261120  }
   0x8   :  { %v403_v15 = vpack.c.bf16 %v35_v14, %v34_v13  ;;  %v36_v16 = vld [vmem:[%s599_s1 + $0x50] sm:$0xff]  ;;  %v37_v17 = vld [vmem:[%s599_s1 + $0x58] sm:$0xff]  ;;  %v38_v19 = vld [vmem:[%s599_s1 + $0x60] sm:$0xff]  ;;  %s464_s23 = smov [#allocation2]   ;;  %vm297_vm2 = vcmask 8192  }
   0x9   :  { %394 = vmatpush3.bf16.msra.mxu0 %v391_v5  ;;  %v407_v18 = vpack.c.bf16 %v37_v17, %v36_v16  ;;  %v39_v20 = vld [vmem:[%s599_s1 + $0x68] sm:$0xff]  ;;  %v40_v22 = vld [vmem:[%s599_s1 + $0x70] sm:$0xff]  ;;  %v41_v23 = vld [vmem:[%s599_s1 + $0x78] sm:$0xff]  ;;  %s305_s24 = sshll.u32 %s464_s23, 4  ;;  %s306_s24 = int_to_ptr.vmem [resolvable:$true] %s305_s24 }
   0xa   :  { %396 = vmatprep.subr.bf16.mxu0 %v395_v8  ;;  %v411_v21 = vpack.c.bf16 %v39_v20, %v38_v19  ;;  %v415_v24 = vpack.c.bf16 %v41_v23, %v40_v22  ;;  %v557_v25 = vld [vmem:[%s598_s0 + $0x8] sm:$0xff]  ;;  %v313_v26 = vld [vmem:[%s600_s2] ss:$0 sm:$0xff]  ;;  %s462_s0 = smov 32   ;;  %v146_v38 = vld [vmem:[%s601_s3 + $0x10] sm:$0xff]  ;;  %s438_s25 = scalar_lea.vmem %s306_s24, 16 }
   0xb   :  { %v144_v31 = vld [vmem:[%s601_s3] sm:$0xff]  ;;  %v145_v32 = vld [vmem:[%s601_s3 + $0x8] sm:$0xff]  ;;  %v147_v39 = vld [vmem:[%s601_s3 + $0x18] sm:$0xff]  ;;  %p439_p0 = scmp.ne.s32.totalorder %s306_s24, %s438_s25  ;;  %s442_s26 = scalar_lea.vmem %s306_s24, 32 }
   0xc   :  { %v419_v36 = vpack.c.bf16 %v145_v32, %v144_v31  ;;  %v423_v42 = vpack.c.bf16 %v147_v39, %v146_v38  ;;  %v130_v55 = vld [vmem:[%s603_s5] sm:$0xff]  ;;  %v131_v58 = vld [vmem:[%s603_s5 + $0x8] sm:$0xff]  ;;  %p443_p1 = scmp.lt.s32.totalorder %s306_s24, %s306_s24  ;;  %p444_p2 = scmp.lt.s32.totalorder %s442_s26, %s438_s25 }
   0xd   :  { %398 = vmatpush3.bf16.msra.mxu0 %v395_v8  ;;  %v314_v4 = vld [vmem:[%s602_s4] ss:$0 sm:$0xff] }
   0xe   :  { %400 = vmatprep.subr.bf16.mxu0 %v399_v12  ;;  %420 = vmatprep.subr.bf16.mxu1 %v419_v36  ;;  %p445_p3 = por %p444_p2, %p443_p1 }
   0xf   :  { %422 = vmatpush3.bf16.msra.mxu1 %v419_v36 }
  0x10   :  { %424 = vmatprep.subr.bf16.mxu1 %v423_v42  ;;  %p446_p4 = pnand %p445_p3, %p439_p0 }
  0x11   :  { %402 = vmatpush3.bf16.msra.mxu0 %v399_v12 }
  0x12   :  { %404 = vmatprep.subr.bf16.mxu0 %v403_v15 }
  0x13   :  { %426 = vmatpush3.bf16.msra.mxu1 %v423_v42 }
  0x15   :  { %406 = vmatpush3.bf16.msra.mxu0 %v403_v15 }
  0x16   :  { %408 = vmatprep.subr.bf16.mxu0 %v407_v18 }
  0x19   :  { %410 = vmatpush3.bf16.msra.mxu0 %v407_v18 }
  0x1a   :  { %412 = vmatprep.subr.bf16.mxu0 %v411_v21 }
  0x1d   :  { %414 = vmatpush3.bf16.msra.mxu0 %v411_v21 }
  0x1e   :  { %416 = vmatprep.subr.bf16.mxu0 %v415_v24 }
  0x21   :  { %418 = vmatpush3.bf16.msra.mxu0 %v415_v24 }
  0x24   :  { %374 = vmatmul.mubr.f32.vlgmr.msra.gmra.mrb[0].mxu0 %v557_v25 }
  0xf7   :  { %v375_v27 = vpop.f32.mrb[0].mxu0 }
  0xf8   :  { %v121_v28 = vadd.f32 %v375_v27, %v313_v26  ;;  %v115_v29 = vpop.f32.mrb[1].mxu0 }
  0xf9   :  { %v116_v30 = vadd.f32 %v313_v26, %v115_v29 }
  0xfa   :  { %v125_v33 = vmul.f32 0.5, %v121_v28  ;;  %v256_v41 = vmul.f32 %v121_v28, %v121_v28  ;;  %v254_v50 = vadd.f32 1.0, %v121_v28 }
  0xfb   :  { %v124_v34 = vmul.f32 0.5, %v116_v30  ;;  %v255_v35 = vmul.f32 %v116_v30, %v116_v30  ;;  %v253_v45 = vadd.f32 1.0, %v116_v30 }
  0xfc   :  { %v128_v40 = vmul.f32 1.442695, %v125_v33 }
  0xfd   :  { %v126_v37 = vmul.f32 1.442695, %v124_v34  ;;  %259 = vrot.lane.b32.xlu1 %v255_v35, %s462_s0 }
  0xff   :  { %434 = vpow2.f32 %v126_v37 }
 0x100   :  { %436 = vpow2.f32 %v128_v40 }
 0x101   :  { %261 = vrot.lane.b32.xlu1 %v256_v41, %s462_s0 }
 0x109   :  { %v435_v43 = vpop.eup %434 }
 0x10a   :  { %134 = vrot.lane.b32.xlu0 %v435_v43, %s463_s17  ;;  %v437_v44 = vpop.eup %436  ;;  %v267_v48 = vmul.f32 %v435_v43, %v435_v43 }
 0x10b   :  { %v268_v52 = vmul.f32 %v437_v44, %v437_v44 }
 0x10e   :  { %136 = vrot.lane.b32.xlu0 %v437_v44, %s463_s17 }
 0x16f   :  { %v260_v46 = vpop.permute.xlu1 %259 }
 0x170   :  { %v265_v47 = vsub.f32 %v253_v45, %v260_v46 }
 0x172   :  { %v269_v49 = vsub.f32 %v265_v47, %v267_v48 }
 0x173   :  { %v262_v51 = vpop.permute.xlu1 %261 }
 0x174   :  { %v266_v53 = vsub.f32 %v254_v50, %v262_v51  ;;  %273 = vrot.lane.b32.xlu0 %v269_v49, %s463_s17 }
 0x176   :  { %v270_v54 = vsub.f32 %v266_v53, %v268_v52 }
 0x178   :  { %275 = vrot.lane.b32.xlu1 %v270_v54, %s463_s17 }
 0x17c   :  { %v135_v56 = vpop.permute.xlu0 %134 }
 0x17d   :  { %v140_v57 = vmul.f32 %v135_v56, %v130_v55 }
 0x17f   :  { %v142_v59 = vadd.f32 %v140_v57, %v116_v30 }
 0x180   :  { %v137_v60 = vpop.permute.xlu0 %136 }
 0x181   :  { %v141_v61 = vmul.f32 %v137_v60, %v131_v58  ;;  %384 = vmatprep.mubr.msk.f32.mxu1 %vm155_vm0, %v142_v59 }
 0x183   :  { %v143_v62 = vadd.f32 %v141_v61, %v121_v28 }
 0x185   :  { %385 = vmatmul.mubr.msk.f32.vlgmr.msra.gmra.mrb[0].mxu1 %vm155_vm0, %v143_v62 }
 0x1e6   :  { %v274_v63 = vpop.permute.xlu0 %273 }
 0x1e7   :  { %v279_v1 = vsel %vm155_vm0, %v274_v63, 0.0 }
 0x1ea   :  { %v276_v0 = vpop.permute.xlu1 %275 }
 0x1eb   :  { %v280_v2 = vsel %vm155_vm0, %v276_v0, 0.0 }
 0x1ec   :  { %v281_v3 = vadd.f32 %v280_v2, %v279_v1 }
 0x1ee   :  { %282 = vadd.xlane.f32.xlu1 %v281_v3 }
 0x258   :  { %v386_v5 = vpop.f32.mrb[0].mxu1 }
 0x259   :  { %v234_v6 = vadd.f32 %v386_v5, %v314_v4  ;;  %v228_v7 = vpop.f32.mrb[1].mxu1 }
 0x25a   :  { %v229_v8 = vadd.f32 %v314_v4, %v228_v7 }
 0x25b   :  { %v238_v10 = vsub.f32 %v234_v6, %v557_v25 }
 0x25c   :  { %v237_v11 = vsub.f32 %v229_v8, %v521_v9  ;;  %v293_v9 = vlaneseq }
 0x25d   :  { %v240_v12 = vmul.f32 %v238_v10, %v238_v10 }
 0x25e   :  { %v239_v13 = vmul.f32 %v237_v11, %v237_v11  ;;  %v294_v29 = vand.u32 127, %v293_v9 }
 0x260   :  { %v241_v14 = vadd.f32 %v240_v12, %v239_v13  ;;  %vm295_vm1 = vcmp.eq.s32.totalorder %v294_v29, 0 }
 0x262   :  { %242 = vadd.xlane.f32.xlu0 %v241_v14 }
 0x27b   :  { %v283_v15 = vpop.xlane.xlu1 %282 }
 0x27c   :  { %v284_v16 = vrot.slane %v283_v15, 4 }
 0x27e   :  { %v285_v17 = vadd.f32 %v284_v16, %v283_v15 }
 0x280   :  { %v286_v18 = vrot.slane %v285_v17, 2 }
 0x282   :  { %v287_v22 = vadd.f32 %v286_v18, %v285_v17 }
 0x284   :  { %v288_v26 = vrot.slane %v287_v22, 1 }
 0x286   :  { %v289_v25 = vadd.f32 %v288_v26, %v287_v22 }
 0x2ef   :  { %v243_v19 = vpop.xlane.xlu0 %242 }
 0x2f0   :  { %v244_v20 = vrot.slane %v243_v19, 4 }
 0x2f2   :  { %v245_v21 = vadd.f32 %v244_v20, %v243_v19 }
 0x2f4   :  { %v246_v23 = vrot.slane %v245_v21, 2 }
 0x2f6   :  { %v247_v24 = vadd.f32 %v246_v23, %v245_v21 }
 0x2f8   :  { %v248_v27 = vrot.slane %v247_v24, 1 }
 0x2fa   :  { %v249_v28 = vadd.f32 %v248_v27, %v247_v24 }
 0x2fc   :  { %427 = vpush %v249_v28 }
 0x2fd   :  { %429 = vpush %v289_v25 }
 0x32d   :  { %s428_s4 = spop %427 }
 0x32e   :  { %v251_v30 = vstv %s428_s4  ;;  %s430_s5 = spop %429 }
 0x32f   :  { %v252_v31 = vmul.f32 0.00048828125, %v251_v30  ;;  %v291_v32 = vstv %s430_s5 }
 0x330   :  { %v292_v33 = vmul.f32 -0.03125, %v291_v32 }
 0x332   :  { %v296_v34 = vsel %vm295_vm1, %v252_v31, %v292_v33 }
 0x333   :  { %298 = vst.msk [vmem:[#allocation2] sm:$0x1] %vm297_vm2, %v296_v34 }
 0x334   :  { %449 = shalt.err (!%p446_p4)
}
 0x335   :  { %s450_s29 = scalar_lea.hbm %s604_s6, 16 }
 0x336   :  { %p451_p5 = scmp.ne.s32.totalorder %s604_s6, %s450_s29  ;;  %p454_p6 = scmp.lt.u32.totalorder %s450_s29, %s604_s6 }
 0x338   :  { %p456_p7 = pnand %p454_p6, %p451_p5 }
 0x33a   :  { %459 = shalt.err (!%p456_p7)
}
 0x33b   :  { %308 = dma.vmem_to_hbm [thread:$0]  %s306_s24, 16, %s604_s6, [#allocation3]  }
 0x33c   :  { %460 = dma.done.wait [#allocation3], 16  }
 0x33d   :  { %461 = vsyncadd [#allocation3], 4294967280 }
 0x33e   :  { %312 = vsyncpa [#allocation3], 1 }

</bundles_post_ra>
